<compile_context>
chip_gen: v6e
topology: v6e:2x2x1
jax: 0.10.0
libtpu: 0.0.40
codegen_flags: <defaults>
</compile_context>

<pallas_src>
import functools

import jax
import jax.numpy as jnp
from jax.experimental import pallas as pl
from jax.experimental.pallas import tpu as pltpu

_LANE = 128

# Feature-detect BlockSpec(pipeline_mode=pl.Buffered(...)) support once.
try:
    pl.BlockSpec((8, 128), lambda i: (0, 0), pipeline_mode=pl.Buffered(1))
    _HAS_PIPELINE_MODE = True
except Exception:  # pragma: no cover - older jax
    _HAS_PIPELINE_MODE = False


def _round_up(x, m):
    return (x + m - 1) // m * m


def _tpu_vmem_capacity_bytes():
    try:
        return int(pltpu.get_tpu_info().vmem_capacity_bytes)
    except Exception:
        return 64 << 20  # conservative (v7x-sized) fallback


def _projhead_kernel(x_ref, w1_ref, b1_ref, w2_ref, b2_ref, o_ref):
    # x_ref : (bm, feat_dim)
    # w1_ref: (feat_dim, hidden_p)   b1_ref: (1, hidden_p)
    # w2_ref: (hidden_p, head_dim)   b2_ref: (1, head_dim)
    # o_ref : (bm, head_dim)
    x = x_ref[...]
    h = jnp.dot(x, w1_ref[...], preferred_element_type=jnp.float32)
    h = jnp.maximum(h + b1_ref[...], 0.0)
    o = jnp.dot(h.astype(w2_ref.dtype), w2_ref[...],
                preferred_element_type=jnp.float32)
    o_ref[...] = (o + b2_ref[...]).astype(o_ref.dtype)


def prepare_proj_head_params(w1, b1, w2, b2, compute_dtype=None):
    """One-time repack of PyTorch-layout params, OUTSIDE the jit'd hot path.

    Inputs (PyTorch nn.Linear layout):
        w1: (hidden, feat), b1: (hidden,), w2: (head, hidden), b2: (head,)
    Returns (in, out)-layout weights; only the *hidden* axis is zero-padded to a
    multiple of 128 (exact: padded hidden cols give ReLU(0)=0 and the matching
    w2 rows are 0).  The head axis is left unpadded so the output store writes
    exactly head_dim lanes.  Optionally casts params to compute_dtype (e.g.
    jnp.bfloat16) for MXU-peak throughput with f32 accumulation.
    """
    hidden_dim, feat_dim = w1.shape
    head_dim = w2.shape[0]
    hidden_p = _round_up(hidden_dim, _LANE)

    if compute_dtype is not None:
        w1, b1, w2, b2 = (a.astype(compute_dtype) for a in (w1, b1, w2, b2))

    w1_t = jnp.zeros((feat_dim, hidden_p), w1.dtype).at[:, :hidden_dim].set(w1.T)
    b1_p = jnp.zeros((1, hidden_p), b1.dtype).at[:, :hidden_dim].set(b1)
    w2_t = jnp.zeros((hidden_p, head_dim), w2.dtype).at[:hidden_dim, :].set(w2.T)
    b2_p = b2.reshape(1, head_dim)
    return w1_t, b1_p, w2_t, b2_p


@functools.partial(jax.jit, static_argnames=("block_rows",))
def proj_head_forward(feat, w1_t, b1_p, w2_t, b2_p, *, block_rows=None):
    """feat: (N, feat_dim). Params must come from prepare_proj_head_params."""
    n, feat_dim = feat.shape
    hidden_p = w1_t.shape[1]
    head_dim = w2_t.shape[1]
    x_itemsize = jnp.dtype(feat.dtype).itemsize
    w_itemsize = jnp.dtype(w1_t.dtype).itemsize

    vmem_cap = _tpu_vmem_capacity_bytes()
    vmem_budget = int(0.8 * vmem_cap)  # ~51 MiB on v7x, ~102 MiB on v5e/v6e

    # Sublane alignment: 8 rows for 4-byte dtypes, 16 for bf16, 32 for 1-byte.
    row_align = 8 * max(1, 4 // x_itemsize)

    # Bigger default batch tile on 128 MiB parts (v5e/v6e); 512 on v7x.
    if block_rows is None:
        block_rows = 1024 if vmem_cap >= (100 << 20) else 512

    bm = min(_round_up(block_rows, row_align), _round_up(n, row_align))
    # Keep >= 2 grid steps when possible so both v7x TensorCores get work.
    if n > 2 * row_align:
        bm = min(bm, _round_up(pl.cdiv(n, 2), row_align))

    weight_bytes = (feat_dim * hidden_p + hidden_p
                    + hidden_p * head_dim + head_dim) * w_itemsize
    # Grid-invariant weights: single-buffer them once the footprint matters.
    single_buffer_weights = _HAS_PIPELINE_MODE and weight_bytes > (4 << 20)
    weight_buf = 1 if single_buffer_weights else 2

    def _vmem_est(bm_):
        return (2 * bm_ * feat_dim * x_itemsize      # double-buffered x tiles
                + 2 * bm_ * head_dim * x_itemsize    # double-buffered out tiles
                + weight_buf * weight_bytes          # resident weights/biases
                + bm_ * hidden_p * 4                 # f32 hidden intermediate
                + bm_ * head_dim * 4)                # f32 acc before output cast

    # Shrink bm (never clip the limit below the requirement) until we fit.
    while bm > row_align and _vmem_est(bm) > vmem_budget:
        bm = max(row_align, _round_up(bm // 2, row_align))
    # TODO(synk): if the weights alone exceed the budget (feat*hidden bytes over
    # ~16-24 MiB on v7x, ~40-50 MiB on v5e/v6e), add a K-reduction grid axis over
    # hidden with a VMEM f32 accumulator (pl.when init/finalize, axis "arbitrary").

    est = _vmem_est(bm)
    vmem_limit = int(min(max(est + est // 4, 4 << 20), vmem_budget))

    grid = (pl.cdiv(n, bm),)  # ragged last block: OOB rows masked on store

    def _const_spec(shape):
        idx = lambda i: (0,) * len(shape)
        if single_buffer_weights:
            return pl.BlockSpec(shape, idx, pipeline_mode=pl.Buffered(1))
        return pl.BlockSpec(shape, idx)

    flops = 2 * n * (feat_dim * hidden_p + hidden_p * head_dim)
    bytes_accessed = n * (feat_dim + head_dim) * x_itemsize + weight_bytes

    return pl.pallas_call(
        _projhead_kernel,
        out_shape=jax.ShapeDtypeStruct((n, head_dim), feat.dtype),
        grid_spec=pltpu.PrefetchScalarGridSpec(
            num_scalar_prefetch=0,
            grid=grid,
            in_specs=[
                pl.BlockSpec((bm, feat_dim), lambda i: (i, 0)),
                _const_spec((feat_dim, hidden_p)),
                _const_spec((1, hidden_p)),
                _const_spec((hidden_p, head_dim)),
                _const_spec((1, head_dim)),
            ],
            out_specs=pl.BlockSpec((bm, head_dim), lambda i: (i, 0)),
        ),
        compiler_params=pltpu.CompilerParams(
            dimension_semantics=("parallel",),
            vmem_limit_bytes=vmem_limit,
        ),
        cost_estimate=pl.CostEstimate(
            flops=flops, transcendentals=0, bytes_accessed=bytes_accessed),
    )(feat, w1_t, b1_p, w2_t, b2_p)


def init_proj_head_params(key, feat_dim, hidden_dim, head_dim, dtype=jnp.float32):
    """Deterministic init mimicking torch.nn.Linear defaults (uniform +/- 1/sqrt(fan_in))."""
    k1, k2, k3, k4 = jax.random.split(key, 4)
    bound1 = 1.0 / (feat_dim ** 0.5)
    bound2 = 1.0 / (hidden_dim ** 0.5)
    w1 = jax.random.uniform(k1, (hidden_dim, feat_dim), dtype, -bound1, bound1)
    b1 = jax.random.uniform(k2, (hidden_dim,), dtype, -bound1, bound1)
    w2 = jax.random.uniform(k3, (head_dim, hidden_dim), dtype, -bound2, bound2)
    b2 = jax.random.uniform(k4, (head_dim,), dtype, -bound2, bound2)
    return w1, b1, w2, b2


if __name__ == "__main__":
    # Small shapes consistent with the module: ProjHead(feat_dim=32, hidden=64, head=16).
    key = jax.random.PRNGKey(0)
    k_feat, k_feat2, k_params = jax.random.split(key, 3)

    N, FEAT, HIDDEN, HEAD = 8, 32, 64, 16
    w1, b1, w2, b2 = init_proj_head_params(k_params, FEAT, HIDDEN, HEAD)
    params = prepare_proj_head_params(w1, b1, w2, b2)  # once, outside hot path

    def ref_fn(x):
        return jnp.maximum(x @ w1.T + b1, 0.0) @ w2.T + b2

    # Case 1: tiny batch (single grid step).
    feat = jax.random.normal(k_feat, (N, FEAT), jnp.float32)
    out = jax.block_until_ready(proj_head_forward(feat, *params))
    assert out.shape == (N, HEAD)
    assert jnp.allclose(out, ref_fn(feat), atol=1e-5, rtol=1e-5), "mismatch (N=8)"

    # Case 2: batch not a multiple of the tile size (exercises the ragged last block).
    N2 = 50
    feat2 = jax.random.normal(k_feat2, (N2, FEAT), jnp.float32)
    out2 = jax.block_until_ready(proj_head_forward(feat2, *params))
    assert out2.shape == (N2, HEAD)
    assert jnp.allclose(out2, ref_fn(feat2), atol=1e-5, rtol=1e-5), "mismatch (N=50)"

    print("KERNEL_OK")
</pallas_src>

<mosaic_0001>
module attributes {stable_mosaic.version = 11 : i64} {
  func.func @_projhead_kernel(%arg0: i32, %arg1: memref<8x32xf32, #tpu.memory_space<vmem>>, %arg2: memref<32x128xf32, #tpu.memory_space<vmem>>, %arg3: memref<1x128xf32, #tpu.memory_space<vmem>>, %arg4: memref<128x16xf32, #tpu.memory_space<vmem>>, %arg5: memref<1x16xf32, #tpu.memory_space<vmem>>, %arg6: memref<8x16xf32, #tpu.memory_space<vmem>>) attributes {dimension_semantics = [#tpu.dimension_semantics<parallel>], iteration_bounds = array<i64: 1>, scalar_prefetch = 0 : i64, scratch_operands = 0 : i64, tpu.core_type = #tpu.core_type<tc>, window_params = [{transform_indices = @transform_0, window_bounds = array<i64: 8, 32>}, {pipeline_mode = #tpu.pipeline_mode<synchronous>, transform_indices = @transform_1, window_bounds = array<i64: 32, 128>}, {pipeline_mode = #tpu.pipeline_mode<synchronous>, transform_indices = @transform_2, window_bounds = array<i64: 1, 128>}, {pipeline_mode = #tpu.pipeline_mode<synchronous>, transform_indices = @transform_3, window_bounds = array<i64: 128, 16>}, {pipeline_mode = #tpu.pipeline_mode<synchronous>, transform_indices = @transform_4, window_bounds = array<i64: 1, 16>}, {transform_indices = @transform_5, window_bounds = array<i64: 8, 16>}]} {
    %c0 = arith.constant 0 : index
    %c0_0 = arith.constant 0 : index
    %0 = vector.load %arg1[%c0, %c0_0] : memref<8x32xf32, #tpu.memory_space<vmem>>, vector<8x32xf32>
    %c0_1 = arith.constant 0 : index
    %c0_2 = arith.constant 0 : index
    %1 = vector.load %arg2[%c0_1, %c0_2] : memref<32x128xf32, #tpu.memory_space<vmem>>, vector<32x128xf32>
    %cst = arith.constant dense<0.000000e+00> : vector<8x128xf32>
    %2 = tpu.matmul %0, %1, %cst {dimension_numbers = #tpu.dot_dimension_numbers<[1], [0], [0], [1], [0, 0, 1, 1], [], []>} : vector<8x32xf32>, vector<32x128xf32>, vector<8x128xf32> -> vector<8x128xf32>
    %c0_3 = arith.constant 0 : index
    %c0_4 = arith.constant 0 : index
    %3 = vector.load %arg3[%c0_3, %c0_4] : memref<1x128xf32, #tpu.memory_space<vmem>>, vector<1x128xf32>
    %4 = vector.broadcast %3 : vector<1x128xf32> to vector<8x128xf32>
    %5 = arith.addf %2, %4 : vector<8x128xf32>
    %cst_5 = arith.constant 0.000000e+00 : f32
    %6 = vector.broadcast %cst_5 : f32 to vector<8x128xf32>
    %7 = arith.maximumf %5, %6 : vector<8x128xf32>
    %c0_6 = arith.constant 0 : index
    %c0_7 = arith.constant 0 : index
    %8 = vector.load %arg4[%c0_6, %c0_7] : memref<128x16xf32, #tpu.memory_space<vmem>>, vector<128x16xf32>
    %cst_8 = arith.constant dense<0.000000e+00> : vector<8x16xf32>
    %9 = tpu.matmul %7, %8, %cst_8 {dimension_numbers = #tpu.dot_dimension_numbers<[1], [0], [0], [1], [0, 0, 1, 1], [], []>} : vector<8x128xf32>, vector<128x16xf32>, vector<8x16xf32> -> vector<8x16xf32>
    %c0_9 = arith.constant 0 : index
    %c0_10 = arith.constant 0 : index
    %10 = vector.load %arg5[%c0_9, %c0_10] : memref<1x16xf32, #tpu.memory_space<vmem>>, vector<1x16xf32>
    %11 = vector.broadcast %10 : vector<1x16xf32> to vector<8x16xf32>
    %12 = arith.addf %9, %11 : vector<8x16xf32>
    %c0_11 = arith.constant 0 : index
    %c0_12 = arith.constant 0 : index
    %13 = vector.load %arg6[%c0_11, %c0_12] : memref<8x16xf32, #tpu.memory_space<vmem>>, vector<8x16xf32>
    tpu.vector_store %arg6[%c0_11, %c0_12], %12 {strides = array<i32>} : memref<8x16xf32, #tpu.memory_space<vmem>>, vector<8x16xf32>,
    return
  }
  func.func @transform_0(%arg0: i32) -> (i32, i32) {
    %c0_i32 = arith.constant 0 : i32
    %c0_i32_0 = arith.constant 0 : i32
    return %arg0, %c0_i32 : i32, i32
  }
  func.func @transform_1(%arg0: i32) -> (i32, i32) {
    %c0_i32 = arith.constant 0 : i32
    %c0_i32_0 = arith.constant 0 : i32
    %c0_i32_1 = arith.constant 0 : i32
    return %c0_i32, %c0_i32_0 : i32, i32
  }
  func.func @transform_2(%arg0: i32) -> (i32, i32) {
    %c0_i32 = arith.constant 0 : i32
    %c0_i32_0 = arith.constant 0 : i32
    %c0_i32_1 = arith.constant 0 : i32
    return %c0_i32, %c0_i32_0 : i32, i32
  }
  func.func @transform_3(%arg0: i32) -> (i32, i32) {
    %c0_i32 = arith.constant 0 : i32
    %c0_i32_0 = arith.constant 0 : i32
    %c0_i32_1 = arith.constant 0 : i32
    return %c0_i32, %c0_i32_0 : i32, i32
  }
  func.func @transform_4(%arg0: i32) -> (i32, i32) {
    %c0_i32 = arith.constant 0 : i32
    %c0_i32_0 = arith.constant 0 : i32
    %c0_i32_1 = arith.constant 0 : i32
    return %c0_i32, %c0_i32_0 : i32, i32
  }
  func.func @transform_5(%arg0: i32) -> (i32, i32) {
    %c0_i32 = arith.constant 0 : i32
    %c0_i32_0 = arith.constant 0 : i32
    return %arg0, %c0_i32 : i32, i32
  }
}

</mosaic_0001>

<bundles_post_ra>
// kernel: proj_head_forward.1
= control target key start
LH: loop header
LB: loop body
LE: loop exit
PB: predicated region body
PF: predicated region fallthrough
CT: control target
= control target key end

     0   :  { %v313_v1 = vmov 0.0   ;;  %vm314_vm0 = vmmov 0   ;;  %vm33_vm1 = vcmask 261120   ;;  %s442_s0 = inlined_call_operand.vmem [shape: f32[8,32], index: 0, kind: input, shape index: {}]   ;;  %s443_s1 = inlined_call_operand.vmem [shape: f32[32,128], index: 1, kind: input, shape index: {}]   ;;  %s444_s2 = inlined_call_operand.vmem [shape: f32[1,128], index: 2, kind: input, shape index: {}]   ;;  %s445_s3 = inlined_call_operand.vmem [shape: f32[128,16], index: 3, kind: input, shape index: {}]   ;;  %s446_s4 = inlined_call_operand.vmem [shape: f32[1,16], index: 4, kind: input, shape index: {}]   ;;  %s447_s5 = inlined_call_operand.hbm [shape: f32[8,16], index: 5, kind: output, shape index: {}]  }
   0x1   :  { %v25_v0 = vld [vmem:[%s443_s1 + $0x18] sm:$0xff]  ;;  %242 = vmatprep.subr.mxu0 %v313_v1  ;;  %v24_v2 = vld [vmem:[%s443_s1 + $0x10] sm:$0xff]  ;;  %250 = vmatprep.mubr.msk.f32.mxu0 %vm314_vm0, %v313_v1  ;;  %v23_v5 = vld [vmem:[%s443_s1 + $0x8] sm:$0xff] }
   0x2   :  { %v123_v3 = vld [vmem:[%s445_s3 + $0x78] sm:$0xff]  ;;  %243 = vmatpush3.msra.mxu0 %v25_v0  ;;  %253 = vmatprep.subr.mxu1 %v313_v1  ;;  %v122_v4 = vld [vmem:[%s445_s3 + $0x70] sm:$0xff]  ;;  %v121_v6 = vld [vmem:[%s445_s3 + $0x68] sm:$0xff] }
   0x3   :  { %244 = vmatprep.subr.mxu0 %v313_v1  ;;  %254 = vmatpush3.msra.mxu1 %v123_v3  ;;  %v22_v7 = vld [vmem:[%s443_s1] sm:$0xff] }
   0x4   :  { %245 = vmatpush3.msra.mxu0 %v24_v2  ;;  %255 = vmatprep.subr.mxu1 %v313_v1  ;;  %v21_v8 = vld [vmem:[%s442_s0] sm:$0xff] }
   0x5   :  { %246 = vmatprep.subr.mxu0 %v313_v1  ;;  %256 = vmatpush3.msra.mxu1 %v122_v4  ;;  %v120_v9 = vld [vmem:[%s445_s3 + $0x60] sm:$0xff] }
   0x6   :  { %247 = vmatpush3.msra.mxu0 %v23_v5  ;;  %257 = vmatprep.subr.mxu1 %v313_v1 }
   0x7   :  { %10 = vsyncpa [#allocation3], 0  ;;  %248 = vmatprep.subr.mxu0 %v313_v1  ;;  %258 = vmatpush3.msra.mxu1 %v121_v6  ;;  %v119_v10 = vld [vmem:[%s445_s3 + $0x58] sm:$0xff]  ;;  %v118_v11 = vld [vmem:[%s445_s3 + $0x50] sm:$0xff]  ;;  %s315_s11 = smov [#allocation2]   ;;  %vm201_vm2 = vcmask 130048  }
   0x8   :  { %249 = vmatpush3.msra.mxu0 %v22_v7  ;;  %259 = vmatprep.subr.mxu1 %v313_v1  ;;  %v117_v12 = vld [vmem:[%s445_s3 + $0x48] sm:$0xff]  ;;  %v116_v13 = vld [vmem:[%s445_s3 + $0x40] sm:$0xff]  ;;  %v115_v14 = vld [vmem:[%s445_s3 + $0x38] sm:$0xff]  ;;  %s209_s0 = sshll.u32 %s315_s11, 4  ;;  %s210_s0 = int_to_ptr.vmem [resolvable:$true] %s209_s0 }
   0x9   :  { %251 = vmatmul.mubr.msk.f32.vlgmr.msra.gmra.mxu0 %vm33_vm1, %v21_v8  ;;  %260 = vmatpush3.msra.mxu1 %v120_v9  ;;  %v114_v15 = vld [vmem:[%s445_s3 + $0x30] sm:$0xff]  ;;  %v113_v16 = vld [vmem:[%s445_s3 + $0x28] sm:$0xff]  ;;  %v112_v17 = vld [vmem:[%s445_s3 + $0x20] sm:$0xff]  ;;  %p296_p1 = scmp.lt.s32.totalorder %s210_s0, %s210_s0 }
   0xa   :  { %261 = vmatprep.subr.mxu1 %v313_v1  ;;  %285 = vmatprep.mubr.msk.f32.mxu1 %vm314_vm0, %v313_v1  ;;  %v111_v18 = vld [vmem:[%s445_s3 + $0x18] sm:$0xff]  ;;  %v110_v19 = vld [vmem:[%s445_s3 + $0x10] sm:$0xff]  ;;  %v109_v20 = vld [vmem:[%s445_s3 + $0x8] sm:$0xff] }
   0xb   :  { %262 = vmatpush3.msra.mxu1 %v119_v10  ;;  %v108_v21 = vld [vmem:[%s445_s3] sm:$0xff]  ;;  %s291_s3 = scalar_lea.vmem %s210_s0, 128 }
   0xc   :  { %263 = vmatprep.subr.mxu1 %v313_v1  ;;  %v217_v22 = vld [vmem:[%s444_s2] ss:$0 sm:$0xff]  ;;  %p292_p0 = scmp.ne.s32.totalorder %s210_s0, %s291_s3  ;;  %p297_p2 = scmp.lt.s32.totalorder %s291_s3, %s291_s3 }
   0xd   :  { %264 = vmatpush3.msra.mxu1 %v118_v11  ;;  %v219_v27 = vld [vmem:[%s446_s4] ss:$0 sm:$0xff] }
   0xe   :  { %265 = vmatprep.subr.mxu1 %v313_v1  ;;  %p298_p3 = por %p297_p2, %p296_p1 }
   0xf   :  { %266 = vmatpush3.msra.mxu1 %v117_v12 }
  0x10   :  { %267 = vmatprep.subr.mxu1 %v313_v1  ;;  %p299_p4 = pnand %p298_p3, %p292_p0 }
  0x11   :  { %268 = vmatpush3.msra.mxu1 %v116_v13 }
  0x12   :  { %269 = vmatprep.subr.mxu1 %v313_v1 }
  0x13   :  { %270 = vmatpush3.msra.mxu1 %v115_v14 }
  0x14   :  { %271 = vmatprep.subr.mxu1 %v313_v1 }
  0x15   :  { %272 = vmatpush3.msra.mxu1 %v114_v15 }
  0x16   :  { %273 = vmatprep.subr.mxu1 %v313_v1 }
  0x17   :  { %274 = vmatpush3.msra.mxu1 %v113_v16 }
  0x18   :  { %275 = vmatprep.subr.mxu1 %v313_v1 }
  0x19   :  { %276 = vmatpush3.msra.mxu1 %v112_v17 }
  0x1a   :  { %277 = vmatprep.subr.mxu1 %v313_v1 }
  0x1b   :  { %278 = vmatpush3.msra.mxu1 %v111_v18 }
  0x1c   :  { %279 = vmatprep.subr.mxu1 %v313_v1 }
  0x1d   :  { %280 = vmatpush3.msra.mxu1 %v110_v19 }
  0x1e   :  { %281 = vmatprep.subr.mxu1 %v313_v1 }
  0x1f   :  { %282 = vmatpush3.msra.mxu1 %v109_v20 }
  0x20   :  { %283 = vmatprep.subr.mxu1 %v313_v1 }
  0x21   :  { %284 = vmatpush3.msra.mxu1 %v108_v21 }
  0xc9   :  { %v103_v23 = vpop.f32.mrf.mxu0 }
  0xca   :  { %v104_v24 = vadd.f32 %v217_v22, %v103_v23 }
  0xcb   :  { %v252_v25 = vpop.f32.mrf.mxu0 }
  0xcc   :  { %v107_v26 = vmax.f32 %v104_v24, 0.0 }
  0xce   :  { %286 = vmatmul.mubr.f32.vlgmr.msra.gmra.mxu1 %v107_v26 }
 0x18e   :  { %v197_v28 = vpop.f32.mrf.mxu1 }
 0x18f   :  { %v198_v29 = vadd.f32 %v219_v27, %v197_v28 }
 0x190   :  { %v287_v30 = vpop.f32.mrf.mxu1 }
 0x191   :  { %202 = vst.msk [vmem:[#allocation2] sm:$0xff] %vm201_vm2, %v198_v29 }
 0x192   :  { %302 = shalt.err (!%p299_p4)
}
 0x193   :  { %212 = dma.vmem_to_hbm [thread:$0]  %s210_s0, 128, %s447_s5, [#allocation3]  }
 0x194   :  { %311 = dma.done.wait [#allocation3], 128  }
 0x195   :  { %312 = vsyncadd [#allocation3], 4294967168 }
 0x196   :  { %216 = vsyncpa [#allocation3], 1 }

</bundles_post_ra>
